<compile_context>
chip_gen: v7x
topology: tpu7x:2x2x1
jax: 0.10.0
libtpu: 0.0.40
codegen_flags: <defaults>
</compile_context>

<pallas_src>
import functools

import jax
import jax.numpy as jnp
from jax.experimental import pallas as pl
from jax.experimental.pallas import tpu as pltpu


def _folder_kernel(x_ref, o_ref, *, H, W):
    """Process one block of flattened (n, c) rows.

    x_ref: (CB, HW)     input rows, spatial dims flattened onto the lane axis
    o_ref: (CB, 9*HW)   per row: the 9 shifted copies (k = kh*3 + kw)
                        concatenated along the lane axis
    """
    HW = H * W
    CB = x_ref.shape[0]
    x = x_ref[...]                                       # (CB, HW)

    # Zero-pad once along the lane axis; every 3x3 offset then becomes a
    # static shifted-window slice (no rolls). Row (vertical) image boundaries
    # come out as zeros for free from this padding.
    pad = W + 1                                          # covers |offset|<=W+1
    zpad = jnp.zeros((CB, pad), dtype=x.dtype)
    xpad = jnp.concatenate([zpad, x, zpad], axis=1)      # (CB, HW + 2W + 2)

    # Hoisted column-boundary masks (built once per block, reused by 3 offsets
    # each); single zeros vreg reused for the masked select.
    col = jax.lax.broadcasted_iota(jnp.int32, (CB, HW), 1) % W
    left_ok = col >= 1                                   # valid when dx == -1
    right_ok = col <= W - 2                              # valid when dx == +1
    zero = jnp.zeros_like(x)

    # Stream the 9 offsets: compute each shifted window and store it straight
    # into its lane slice of the output block (dense, full-width stores).
    for kh in range(3):
        dy = kh - 1
        for kw in range(3):
            dx = kw - 1
            k = kh * 3 + kw
            off = dy * W + dx                            # flattened shift
            shifted = xpad[:, pad + off:pad + off + HW]  # (CB, HW), static
            if dx == -1:
                shifted = jnp.where(left_ok, shifted, zero)
            elif dx == 1:
                shifted = jnp.where(right_ok, shifted, zero)
            o_ref[:, k * HW:(k + 1) * HW] = shifted


def _pick_row_block(rows, hw, itemsize):
    """Pick the (n, c)-row block size cb (multiple of 8) such that:
       - the OUTPUT tile (9x the input, the dominant DMA) is ~2 MiB per step,
       - the double-buffered in+out blocks plus in-kernel temporaries stay
         well under the 32 MiB scoped-VMEM request (safe on v5e/v6e/v7x),
       - the grid keeps >= 4 steps when rows allow (>= 2 per v7x TensorCore
         under dimension_semantics=('parallel',))."""
    bytes_per_row = hw * itemsize

    # Target ~2 MiB of writeback per step.
    target_out_bytes = 2 * 1024 * 1024
    cb = target_out_bytes // (9 * bytes_per_row)
    cb = max(8, (int(cb) // 8) * 8)

    # VMEM model per step: 2x double-buffered (1 input + 9 output) tiles plus
    # ~6 input-tile-sized temporaries (xpad, masks, zero, live shifted window)
    # -> ~26 input tiles.  Keep under ~24 MiB headroom of the 32 MiB request.
    vmem_budget = 24 * 1024 * 1024
    while cb > 8 and 26 * cb * bytes_per_row > vmem_budget:
        cb -= 8

    # Keep >= 4 grid steps when the row count allows it.
    max_cb_for_steps = max(8, ((-(-rows // 4)) + 7) // 8 * 8)
    cb = min(cb, max_cb_for_steps)
    return max(8, cb)


def folder(x, *, row_block=None, vmem_limit_bytes=32 * 1024 * 1024):
    """Pallas equivalent of Folder.forward (unfold k=3, pad=1, stride=1)."""
    N, C, H, W = x.shape
    HW = H * W
    rows = N * C
    itemsize = jnp.dtype(x.dtype).itemsize

    cb = row_block if row_block is not None else _pick_row_block(
        rows, HW, itemsize)
    rows_padded = -(-rows // cb) * cb

    xf = x.reshape(rows, HW)                  # free view: lane-dense spatial
    if rows_padded != rows:
        xf = jnp.pad(xf, ((0, rows_padded - rows), (0, 0)))

    out = pl.pallas_call(
        functools.partial(_folder_kernel, H=H, W=W),
        out_shape=jax.ShapeDtypeStruct((rows_padded, 9 * HW), x.dtype),
        grid=(rows_padded // cb,),
        in_specs=[pl.BlockSpec((cb, HW), lambda i: (i, 0))],
        out_specs=pl.BlockSpec((cb, 9 * HW), lambda i: (i, 0)),
        compiler_params=pltpu.CompilerParams(
            dimension_semantics=("parallel",),
            vmem_limit_bytes=vmem_limit_bytes),
        cost_estimate=pl.CostEstimate(
            flops=0, transcendentals=0,
            bytes_accessed=10 * rows * HW * itemsize),
    )(xf)

    if rows_padded != rows:
        out = out[:rows]
    # Free view back to the module's NCHW output layout: (rows, 9*HW) and
    # (N, C*9, H, W) share the same row-major memory order.
    return out.reshape(N, C * 9, H, W)


def folder_ref(x):
    """Pure-JAX reference (matches torch.nn.functional.unfold semantics)."""
    N, C, H, W = x.shape
    xp = jnp.pad(x, ((0, 0), (0, 0), (1, 1), (1, 1)))
    patches = [xp[:, :, kh:kh + H, kw:kw + W]
               for kh in range(3) for kw in range(3)]
    return jnp.stack(patches, axis=2).reshape(N, C * 9, H, W)


if __name__ == "__main__":
    key = jax.random.PRNGKey(0)
    # Module has no parameters; only an input feature map is needed.
    x = jax.random.normal(key, (2, 4, 16, 16), dtype=jnp.float32)

    out = folder(x)
    out = jax.block_until_ready(out)

    ref = folder_ref(x)
    assert out.shape == (2, 4 * 9, 16, 16), out.shape
    assert jnp.allclose(out, ref, atol=1e-6, rtol=1e-6), "mismatch vs reference"
    print("KERNEL_OK")
</pallas_src>

<mosaic_0001>
module attributes {stable_mosaic.version = 11 : i64} {
  func.func @_folder_kernel(%arg0: i32, %arg1: memref<8x256xf32, #tpu.memory_space<vmem>>, %arg2: memref<8x2304xf32, #tpu.memory_space<vmem>>) attributes {dimension_semantics = [#tpu.dimension_semantics<parallel>], iteration_bounds = array<i64: 1>, scalar_prefetch = 0 : i64, scratch_operands = 0 : i64, tpu.core_type = #tpu.core_type<tc>, window_params = [{transform_indices = @transform_0, window_bounds = array<i64: 8, 256>}, {transform_indices = @transform_1, window_bounds = array<i64: 8, 2304>}]} {
    %c0 = arith.constant 0 : index
    %c0_0 = arith.constant 0 : index
    %0 = vector.load %arg1[%c0, %c0_0] : memref<8x256xf32, #tpu.memory_space<vmem>>, vector<8x256xf32>
    %cst = arith.constant 0.000000e+00 : f32
    %1 = vector.broadcast %cst : f32 to vector<8x17xf32>
    %2 = tpu.concatenate %1, %0, %1 in 1 : vector<8x17xf32>, vector<8x256xf32>, vector<8x17xf32> -> vector<8x290xf32>
    %3 = tpu.iota {dimensions = array<i32: 1>} : vector<8x256xi32>
    %c16_i32 = arith.constant 16 : i32
    %c0_i32 = arith.constant 0 : i32
    %4 = arith.cmpi eq, %c16_i32, %c0_i32 : i32
    %c1_i32 = arith.constant 1 : i32
    %5 = arith.select %4, %c1_i32, %c16_i32 : i32
    %6 = vector.broadcast %5 : i32 to vector<8x256xi32>
    %7 = arith.remsi %3, %6 : vector<8x256xi32>
    %c0_i32_1 = arith.constant 0 : i32
    %8 = vector.broadcast %c0_i32_1 : i32 to vector<8x256xi32>
    %9 = arith.cmpi ne, %7, %8 : vector<8x256xi32>
    %c0_i32_2 = arith.constant 0 : i32
    %10 = vector.broadcast %c0_i32_2 : i32 to vector<8x256xi32>
    %11 = arith.cmpi slt, %7, %10 : vector<8x256xi32>
    %c0_i32_3 = arith.constant 0 : i32
    %12 = arith.cmpi slt, %5, %c0_i32_3 : i32
    %13 = vector.broadcast %12 : i1 to vector<8x256xi1>
    %14 = vector.broadcast %13 : vector<8x256xi1> to vector<8x256xi1>
    %15 = arith.xori %11, %14 : vector<8x256xi1>
    %16 = arith.andi %15, %9 : vector<8x256xi1>
    %17 = vector.broadcast %5 : i32 to vector<8x256xi32>
    %18 = arith.addi %7, %17 : vector<8x256xi32>
    %19 = arith.select %16, %18, %7 : vector<8x256xi1>, vector<8x256xi32>
    %c1_i32_4 = arith.constant 1 : i32
    %20 = vector.broadcast %c1_i32_4 : i32 to vector<8x256xi32>
    %21 = arith.cmpi sge, %19, %20 : vector<8x256xi32>
    %c14_i32 = arith.constant 14 : i32
    %22 = vector.broadcast %c14_i32 : i32 to vector<8x256xi32>
    %23 = arith.cmpi sle, %19, %22 : vector<8x256xi32>
    %cst_5 = arith.constant 0.000000e+00 : f32
    %24 = vector.broadcast %cst_5 : f32 to vector<8x256xf32>
    %25 = vector.extract_strided_slice %2 {offsets = [0, 0], sizes = [8, 256], strides = [1, 1]} : vector<8x290xf32> to vector<8x256xf32>
    %26 = arith.select %21, %25, %24 : vector<8x256xi1>, vector<8x256xf32>
    %c0_6 = arith.constant 0 : index
    %c0_7 = arith.constant 0 : index
    %27 = vector.load %arg2[%c0_6, %c0_7] : memref<8x2304xf32, #tpu.memory_space<vmem>>, vector<8x256xf32>
    tpu.vector_store %arg2[%c0_6, %c0_7], %26 {strides = array<i32>} : memref<8x2304xf32, #tpu.memory_space<vmem>>, vector<8x256xf32>,
    %28 = vector.extract_strided_slice %2 {offsets = [0, 1], sizes = [8, 256], strides = [1, 1]} : vector<8x290xf32> to vector<8x256xf32>
    %c0_8 = arith.constant 0 : index
    %c256 = arith.constant 256 : index
    %29 = vector.load %arg2[%c0_8, %c256] : memref<8x2304xf32, #tpu.memory_space<vmem>>, vector<8x256xf32>
    tpu.vector_store %arg2[%c0_8, %c256], %28 {strides = array<i32>} : memref<8x2304xf32, #tpu.memory_space<vmem>>, vector<8x256xf32>,
    %30 = vector.extract_strided_slice %2 {offsets = [0, 2], sizes = [8, 256], strides = [1, 1]} : vector<8x290xf32> to vector<8x256xf32>
    %31 = arith.select %23, %30, %24 : vector<8x256xi1>, vector<8x256xf32>
    %c0_9 = arith.constant 0 : index
    %c512 = arith.constant 512 : index
    %32 = vector.load %arg2[%c0_9, %c512] : memref<8x2304xf32, #tpu.memory_space<vmem>>, vector<8x256xf32>
    tpu.vector_store %arg2[%c0_9, %c512], %31 {strides = array<i32>} : memref<8x2304xf32, #tpu.memory_space<vmem>>, vector<8x256xf32>,
    %33 = vector.extract_strided_slice %2 {offsets = [0, 16], sizes = [8, 256], strides = [1, 1]} : vector<8x290xf32> to vector<8x256xf32>
    %34 = arith.select %21, %33, %24 : vector<8x256xi1>, vector<8x256xf32>
    %c0_10 = arith.constant 0 : index
    %c768 = arith.constant 768 : index
    %35 = vector.load %arg2[%c0_10, %c768] : memref<8x2304xf32, #tpu.memory_space<vmem>>, vector<8x256xf32>
    tpu.vector_store %arg2[%c0_10, %c768], %34 {strides = array<i32>} : memref<8x2304xf32, #tpu.memory_space<vmem>>, vector<8x256xf32>,
    %36 = vector.extract_strided_slice %2 {offsets = [0, 17], sizes = [8, 256], strides = [1, 1]} : vector<8x290xf32> to vector<8x256xf32>
    %c0_11 = arith.constant 0 : index
    %c1024 = arith.constant 1024 : index
    %37 = vector.load %arg2[%c0_11, %c1024] : memref<8x2304xf32, #tpu.memory_space<vmem>>, vector<8x256xf32>
    tpu.vector_store %arg2[%c0_11, %c1024], %36 {strides = array<i32>} : memref<8x2304xf32, #tpu.memory_space<vmem>>, vector<8x256xf32>,
    %38 = vector.extract_strided_slice %2 {offsets = [0, 18], sizes = [8, 256], strides = [1, 1]} : vector<8x290xf32> to vector<8x256xf32>
    %39 = arith.select %23, %38, %24 : vector<8x256xi1>, vector<8x256xf32>
    %c0_12 = arith.constant 0 : index
    %c1280 = arith.constant 1280 : index
    %40 = vector.load %arg2[%c0_12, %c1280] : memref<8x2304xf32, #tpu.memory_space<vmem>>, vector<8x256xf32>
    tpu.vector_store %arg2[%c0_12, %c1280], %39 {strides = array<i32>} : memref<8x2304xf32, #tpu.memory_space<vmem>>, vector<8x256xf32>,
    %41 = vector.extract_strided_slice %2 {offsets = [0, 32], sizes = [8, 256], strides = [1, 1]} : vector<8x290xf32> to vector<8x256xf32>
    %42 = arith.select %21, %41, %24 : vector<8x256xi1>, vector<8x256xf32>
    %c0_13 = arith.constant 0 : index
    %c1536 = arith.constant 1536 : index
    %43 = vector.load %arg2[%c0_13, %c1536] : memref<8x2304xf32, #tpu.memory_space<vmem>>, vector<8x256xf32>
    tpu.vector_store %arg2[%c0_13, %c1536], %42 {strides = array<i32>} : memref<8x2304xf32, #tpu.memory_space<vmem>>, vector<8x256xf32>,
    %44 = vector.extract_strided_slice %2 {offsets = [0, 33], sizes = [8, 256], strides = [1, 1]} : vector<8x290xf32> to vector<8x256xf32>
    %c0_14 = arith.constant 0 : index
    %c1792 = arith.constant 1792 : index
    %45 = vector.load %arg2[%c0_14, %c1792] : memref<8x2304xf32, #tpu.memory_space<vmem>>, vector<8x256xf32>
    tpu.vector_store %arg2[%c0_14, %c1792], %44 {strides = array<i32>} : memref<8x2304xf32, #tpu.memory_space<vmem>>, vector<8x256xf32>,
    %46 = vector.extract_strided_slice %2 {offsets = [0, 34], sizes = [8, 256], strides = [1, 1]} : vector<8x290xf32> to vector<8x256xf32>
    %47 = arith.select %23, %46, %24 : vector<8x256xi1>, vector<8x256xf32>
    %c0_15 = arith.constant 0 : index
    %c2048 = arith.constant 2048 : index
    %48 = vector.load %arg2[%c0_15, %c2048] : memref<8x2304xf32, #tpu.memory_space<vmem>>, vector<8x256xf32>
    tpu.vector_store %arg2[%c0_15, %c2048], %47 {strides = array<i32>} : memref<8x2304xf32, #tpu.memory_space<vmem>>, vector<8x256xf32>,
    return
  }
  func.func @transform_0(%arg0: i32) -> (i32, i32) {
    %c0_i32 = arith.constant 0 : i32
    %c0_i32_0 = arith.constant 0 : i32
    return %arg0, %c0_i32 : i32, i32
  }
  func.func @transform_1(%arg0: i32) -> (i32, i32) {
    %c0_i32 = arith.constant 0 : i32
    %c0_i32_0 = arith.constant 0 : i32
    return %arg0, %c0_i32 : i32, i32
  }
}

</mosaic_0001>

<bundles_post_ra>
// kernel: tpu_custom_call.1
= control target key start
LH: loop header
LB: loop body
LE: loop exit
PB: predicated region body
PF: predicated region fallthrough
CT: control target
= control target key end

     0   :  { %6 = vsyncpa [#allocation3], 0  ;;  %s346_s0 = inlined_call_operand.hbm [shape: f32[8,256], index: 0, kind: input, shape index: {}]   ;;  %s347_s1 = inlined_call_operand.hbm [shape: f32[8,2304], index: 1, kind: output, shape index: {}]  }
   0x1   :  { %7 = vsyncpa [#allocation4], 0  ;;  %s261_s6 = smov [#allocation2]   ;;  %s213_s10 = scalar_lea.hbm %s346_s0, 256 }
   0x2   :  { %s14_s7 = sshll.u32 %s261_s6, 4  ;;  %p214_p0 = scmp.ne.s32.totalorder %s346_s0, %s213_s10  ;;  %s15_s7 = int_to_ptr.vmem [resolvable:$true] %s14_s7 }
   0x3   :  { %p217_p1 = scmp.lt.u32.totalorder %s213_s10, %s346_s0 }
   0x5   :  { %p219_p2 = pnand %p217_p1, %p214_p0 }
   0x7   :  { %222 = shalt.err (!%p219_p2)
}
   0x8   :  { %s223_s15 = scalar_lea.vmem %s15_s7, 256  ;;  %p228_p4 = scmp.lt.s32.totalorder %s15_s7, %s15_s7 }
   0x9   :  { %p224_p3 = scmp.ne.s32.totalorder %s15_s7, %s223_s15  ;;  %p229_p5 = scmp.lt.s32.totalorder %s223_s15, %s223_s15 }
   0xb   :  { %p230_p6 = por %p229_p5, %p228_p4 }
   0xd   :  { %p231_p7 = pnand %p230_p6, %p224_p3 }
   0xf   :  { %234 = shalt.err (!%p231_p7)
}
  0x10   :  { %17 = dma.hbm_to_vmem [thread:$0]  %s346_s0, 256, %s15_s7, [#allocation3]  }
  0x11   :  { %257 = dma.done.wait [#allocation3], 256  }
  0x12   :  { %258 = vsyncadd [#allocation3], 4294967040  ;;  %v21_v0 = vld [vmem:[#allocation2] sm:$0xff]  ;;  %s262_s18 = smov 17   ;;  %v22_v1 = vld [vmem:[#allocation2 + $0x8] sm:$0xff]  ;;  %v36_v2 = vlaneseq  ;;  %vm29_vm0 = vcmask 138240  }
  0x13   :  { %25 = vrot.lane.b32.xlu0 %v21_v0, %s262_s18  ;;  %s263_s0 = smov 126   ;;  %s264_s19 = smov 112   ;;  %vm92_vm3 = vcmask 1031168   ;;  %vm107_vm6 = vcmask 916480   ;;  %vm135_vm7 = vcmask 900096   ;;  %vm150_vm8 = vcmask 785408  }
  0x14   :  { %v37_v3 = vand.u32 127, %v36_v2  ;;  %s265_s20 = smov 110   ;;  %s266_s21 = smov 96   ;;  %vm178_vm9 = vcmask 769024   ;;  %vm79_vm10 = vcmask 1039360   ;;  %vm122_vm11 = vcmask 908288  }
  0x15   :  { %s267_s22 = smov 94   ;;  %s268_s23 = smov 127   ;;  %vm165_vm12 = vcmask 777216  }
  0x16   :  { %v38_v4 = vadd.s32 128, %v37_v3  ;;  %v43_v5 = vand.u32 15, %v37_v3  ;;  %s269_s24 = smov 111   ;;  %s270_s25 = smov 95  }
  0x17   :  { %27 = vrot.lane.b32.xlu0 %v22_v1, %s262_s18  ;;  %s271_s26 = smov [#allocation5]  }
  0x18   :  { %v50_v6 = vand.u32 15, %v38_v4  ;;  %vm294_vm1 = vcmp.ge.s32.totalorder %v43_v5, 1  ;;  %vm306_vm4 = vcmp.le.s32.totalorder %v43_v5, 14  ;;  %s193_s27 = sshll.u32 %s271_s26, 4  ;;  %s194_s27 = int_to_ptr.vmem [resolvable:$true] %s193_s27 }
  0x19   :  { %s235_s28 = scalar_lea.vmem %s194_s27, 2304  ;;  %p240_p9 = scmp.lt.s32.totalorder %s194_s27, %s194_s27 }
  0x1a   :  { %vm300_vm2 = vcmp.ge.s32.totalorder %v50_v6, 1  ;;  %vm310_vm5 = vcmp.le.s32.totalorder %v50_v6, 14  ;;  %p236_p8 = scmp.ne.s32.totalorder %s194_s27, %s235_s28  ;;  %p241_p10 = scmp.lt.s32.totalorder %s235_s28, %s235_s28 }
  0x1c   :  { %p242_p11 = por %p241_p10, %p240_p9 }
  0x1e   :  { %p243_p12 = pnand %p242_p11, %p236_p8 }
  0x85   :  { %v26_v8 = vpop.permute.xlu0 %25 }
  0x86   :  { %v34_v9 = vsel %vm29_vm0, 0.0, %v26_v8 }
  0x87   :  { %86 = vrot.lane.b32.xlu1 %v34_v9, %s263_s0  ;;  %v67_v10 = vsel %vm294_vm1, %v34_v9, 0.0 }
  0x88   :  { %69 = vst [vmem:[#allocation5] sm:$0xff] %v67_v10 }
  0x89   :  { %v28_v12 = vpop.permute.xlu0 %27 }
  0x8a   :  { %v30_v13 = vsel %vm29_vm0, %v26_v8, %v28_v12  ;;  %v35_v14 = vsel %vm29_vm0, %v28_v12, 0.0 }
  0x8b   :  { %90 = vrot.lane.b32.xlu0 %v35_v14, %s263_s0  ;;  %88 = vrot.lane.b32.xlu1 %v30_v13, %s263_s0  ;;  %v68_v15 = vsel %vm300_vm2, %v30_v13, 0.0 }
  0x8c   :  { %70 = vst [vmem:[#allocation5 + $0x8] sm:$0xff] %v68_v15 }
  0x8f   :  { %103 = vrot.lane.b32.xlu0 %v30_v13, %s264_s19  ;;  %101 = vrot.lane.b32.xlu1 %v34_v9, %s264_s19 }
  0x93   :  { %129 = vrot.lane.b32.xlu0 %v34_v9, %s265_s20  ;;  %105 = vrot.lane.b32.xlu1 %v35_v14, %s264_s19 }
  0x97   :  { %133 = vrot.lane.b32.xlu0 %v35_v14, %s265_s20  ;;  %131 = vrot.lane.b32.xlu1 %v30_v13, %s265_s20 }
  0x9b   :  { %146 = vrot.lane.b32.xlu0 %v30_v13, %s266_s21  ;;  %144 = vrot.lane.b32.xlu1 %v34_v9, %s266_s21 }
  0x9f   :  { %172 = vrot.lane.b32.xlu0 %v34_v9, %s267_s22  ;;  %148 = vrot.lane.b32.xlu1 %v35_v14, %s266_s21 }
  0xa3   :  { %176 = vrot.lane.b32.xlu0 %v35_v14, %s267_s22  ;;  %174 = vrot.lane.b32.xlu1 %v30_v13, %s267_s22 }
  0xa7   :  { %75 = vrot.lane.b32.xlu0 %v30_v13, %s268_s23  ;;  %73 = vrot.lane.b32.xlu1 %v34_v9, %s268_s23 }
  0xab   :  { %116 = vrot.lane.b32.xlu0 %v34_v9, %s269_s24  ;;  %77 = vrot.lane.b32.xlu1 %v35_v14, %s268_s23 }
  0xaf   :  { %120 = vrot.lane.b32.xlu0 %v35_v14, %s269_s24  ;;  %118 = vrot.lane.b32.xlu1 %v30_v13, %s269_s24 }
  0xb3   :  { %161 = vrot.lane.b32.xlu0 %v30_v13, %s270_s25  ;;  %159 = vrot.lane.b32.xlu1 %v34_v9, %s270_s25 }
  0xb7   :  { %163 = vrot.lane.b32.xlu1 %v35_v14, %s270_s25 }
  0xf9   :  { %v87_v16 = vpop.permute.xlu1 %86 }
  0xfd   :  { %v91_v19 = vpop.permute.xlu0 %90  ;;  %v89_v20 = vpop.permute.xlu1 %88 }
  0xfe   :  { %v93_v21 = vsel %vm92_vm3, %v87_v16, %v89_v20  ;;  %v94_v22 = vsel %vm92_vm3, %v89_v20, %v91_v19 }
  0xff   :  { %v97_v23 = vsel %vm306_vm4, %v93_v21, 0.0  ;;  %v98_v24 = vsel %vm310_vm5, %v94_v22, 0.0 }
 0x100   :  { %99 = vst [vmem:[#allocation5 + $0x20] sm:$0xff] %v97_v23  ;;  %100 = vst [vmem:[#allocation5 + $0x28] sm:$0xff] %v98_v24 }
 0x101   :  { %v104_v25 = vpop.permute.xlu0 %103  ;;  %v102_v26 = vpop.permute.xlu1 %101 }
 0x102   :  { %v108_v27 = vsel %vm107_vm6, %v102_v26, %v104_v25 }
 0x103   :  { %v112_v28 = vsel %vm294_vm1, %v108_v27, 0.0 }
 0x104   :  { %114 = vst [vmem:[#allocation5 + $0x30] sm:$0xff] %v112_v28 }
 0x105   :  { %v130_v29 = vpop.permute.xlu0 %129  ;;  %v106_v30 = vpop.permute.xlu1 %105 }
 0x106   :  { %v109_v31 = vsel %vm107_vm6, %v104_v25, %v106_v30 }
 0x107   :  { %v113_v32 = vsel %vm300_vm2, %v109_v31, 0.0 }
 0x108   :  { %115 = vst [vmem:[#allocation5 + $0x38] sm:$0xff] %v113_v32 }
 0x109   :  { %v134_v33 = vpop.permute.xlu0 %133  ;;  %v132_v34 = vpop.permute.xlu1 %131 }
 0x10a   :  { %v136_v35 = vsel %vm135_vm7, %v130_v29, %v132_v34  ;;  %v137_v36 = vsel %vm135_vm7, %v132_v34, %v134_v33 }
 0x10b   :  { %v140_v37 = vsel %vm306_vm4, %v136_v35, 0.0  ;;  %v141_v38 = vsel %vm310_vm5, %v137_v36, 0.0 }
 0x10c   :  { %142 = vst [vmem:[#allocation5 + $0x50] sm:$0xff] %v140_v37  ;;  %143 = vst [vmem:[#allocation5 + $0x58] sm:$0xff] %v141_v38 }
 0x10d   :  { %v147_v39 = vpop.permute.xlu0 %146  ;;  %v145_v40 = vpop.permute.xlu1 %144 }
 0x10e   :  { %v151_v41 = vsel %vm150_vm8, %v145_v40, %v147_v39 }
 0x10f   :  { %v155_v42 = vsel %vm294_vm1, %v151_v41, 0.0 }
 0x110   :  { %157 = vst [vmem:[#allocation5 + $0x60] sm:$0xff] %v155_v42 }
 0x111   :  { %v173_v43 = vpop.permute.xlu0 %172  ;;  %v149_v44 = vpop.permute.xlu1 %148 }
 0x112   :  { %v152_v45 = vsel %vm150_vm8, %v147_v39, %v149_v44 }
 0x113   :  { %v156_v46 = vsel %vm300_vm2, %v152_v45, 0.0 }
 0x114   :  { %158 = vst [vmem:[#allocation5 + $0x68] sm:$0xff] %v156_v46 }
 0x115   :  { %v177_v47 = vpop.permute.xlu0 %176  ;;  %v175_v48 = vpop.permute.xlu1 %174 }
 0x116   :  { %v179_v49 = vsel %vm178_vm9, %v173_v43, %v175_v48  ;;  %v180_v50 = vsel %vm178_vm9, %v175_v48, %v177_v47 }
 0x117   :  { %v183_v51 = vsel %vm306_vm4, %v179_v49, 0.0  ;;  %v184_v52 = vsel %vm310_vm5, %v180_v50, 0.0 }
 0x118   :  { %185 = vst [vmem:[#allocation5 + $0x80] sm:$0xff] %v183_v51  ;;  %186 = vst [vmem:[#allocation5 + $0x88] sm:$0xff] %v184_v52 }
 0x119   :  { %v76_v53 = vpop.permute.xlu0 %75  ;;  %v74_v54 = vpop.permute.xlu1 %73 }
 0x11a   :  { %v80_v55 = vsel %vm79_vm10, %v74_v54, %v76_v53 }
 0x11b   :  { %84 = vst [vmem:[#allocation5 + $0x10] sm:$0xff] %v80_v55 }
 0x11d   :  { %v117_v56 = vpop.permute.xlu0 %116  ;;  %v78_v57 = vpop.permute.xlu1 %77 }
 0x11e   :  { %v81_v58 = vsel %vm79_vm10, %v76_v53, %v78_v57 }
 0x11f   :  { %85 = vst [vmem:[#allocation5 + $0x18] sm:$0xff] %v81_v58 }
 0x121   :  { %v121_v59 = vpop.permute.xlu0 %120  ;;  %v119_v60 = vpop.permute.xlu1 %118 }
 0x122   :  { %v123_v61 = vsel %vm122_vm11, %v117_v56, %v119_v60  ;;  %v124_v62 = vsel %vm122_vm11, %v119_v60, %v121_v59 }
 0x123   :  { %127 = vst [vmem:[#allocation5 + $0x40] sm:$0xff] %v123_v61  ;;  %128 = vst [vmem:[#allocation5 + $0x48] sm:$0xff] %v124_v62 }
 0x125   :  { %v162_v63 = vpop.permute.xlu0 %161  ;;  %v160_v0 = vpop.permute.xlu1 %159 }
 0x126   :  { %v166_v1 = vsel %vm165_vm12, %v160_v0, %v162_v63 }
 0x127   :  { %170 = vst [vmem:[#allocation5 + $0x70] sm:$0xff] %v166_v1 }
 0x129   :  { %v164_v2 = vpop.permute.xlu1 %163 }
 0x12a   :  { %v167_v3 = vsel %vm165_vm12, %v162_v63, %v164_v2 }
 0x12b   :  { %171 = vst [vmem:[#allocation5 + $0x78] sm:$0xff] %v167_v3 }
 0x12c   :  { %246 = shalt.err (!%p243_p12)
}
 0x12d   :  { %s247_s2 = scalar_lea.hbm %s347_s1, 2304 }
 0x12e   :  { %p248_p13 = scmp.ne.s32.totalorder %s347_s1, %s247_s2  ;;  %p251_p0 = scmp.lt.u32.totalorder %s247_s2, %s347_s1 }
 0x130   :  { %p253_p1 = pnand %p251_p0, %p248_p13 }
 0x132   :  { %256 = shalt.err (!%p253_p1)
}
 0x133   :  { %196 = dma.vmem_to_hbm [thread:$0]  %s194_s27, 2304, %s347_s1, [#allocation4]  }
 0x134   :  { %259 = dma.done.wait [#allocation4], 2304  }
 0x135   :  { %260 = vsyncadd [#allocation4], 4294964992 }
 0x136   :  { %200 = vsyncpa [#allocation3], 1 }
 0x137   :  { %201 = vsyncpa [#allocation4], 1 }

</bundles_post_ra>
